<compile_context>
chip_gen: v6e
topology: v6e:2x2x1
jax: 0.10.0
libtpu: 0.0.40
codegen_flags: <defaults>
</compile_context>

<pallas_src>
import functools

import jax
import jax.numpy as jnp
from jax.experimental import pallas as pl
from jax.experimental.pallas import tpu as pltpu

_SUBLANE = 8


def _round_up(x, m):
    return ((x + m - 1) // m) * m


def _mlp_kernel(x_ref, w1_ref, b1_ref, w2_ref, b2_ref, w3_ref, b3_ref, o_ref,
                *, cast_bf16):
    def dot(a, w_ref):
        if cast_bf16:
            a = a.astype(jnp.bfloat16)      # weights already bf16 (pre-cast once, off hot path)
        return jnp.dot(a, w_ref[...], preferred_element_type=jnp.float32)

    # hidden layer 1: Linear + ReLU (bias / ReLU in f32)
    h = jnp.maximum(dot(x_ref[...], w1_ref) + b1_ref[...], 0.0)
    # hidden layer 2: Linear + ReLU
    h = jnp.maximum(dot(h, w2_ref) + b2_ref[...], 0.0)
    # output layer: Linear + Tanh
    h = dot(h, w3_ref) + b3_ref[...]
    o_ref[...] = jnp.tanh(h).astype(o_ref.dtype)


def _default_batch_tile(B):
    if B <= 256:
        # Single grid step, whole batch in one tile.
        return max(_SUBLANE, _round_up(B, _SUBLANE))
    # Grid length >= 2 (even when possible) so both v7x TensorCores get work; tiles as large
    # as possible, capped at 2048 rows (safe under v5e's 16 MiB default scoped VMEM).
    half = _round_up(-(-B // 2), 256)
    return min(half, 2048)


def prepare_params(params, *, use_bf16_matmul=False):
    """One-time parameter prep (call once, OUTSIDE the per-step hot path).

    Casts weight matrices to bf16 for the single-pass MXU path when requested.
    Biases stay f32: they are added to the f32 MXU accumulator.
    """
    out = dict(params)
    if use_bf16_matmul:
        for k in ("w1", "w2", "w3"):
            out[k] = params[k].astype(jnp.bfloat16)
    return out


def continuous_action_net(latent, params, *, batch_tile=None):
    """Pallas implementation of ContinuousActionNet.forward.

    latent: [B, latent_dim] float32
    params: dict with w1 [L,H1], b1 [1,H1], w2 [H1,H2], b2 [1,H2], w3 [H2,A], b3 [1,A]
            (weights stored [in, out]; x @ W + b == PyTorch x @ weight.T + bias).
            Weights may be bf16 (see prepare_params) for the fast MXU path.
    returns: [B, A] float32 in (-1, 1)
    """
    B, L = latent.shape
    H1 = params["w1"].shape[1]
    H2 = params["w2"].shape[1]
    A = params["w3"].shape[1]
    cast_bf16 = params["w1"].dtype == jnp.bfloat16

    if batch_tile is None:
        batch_tile = _default_batch_tile(B)
    batch_tile = max(_SUBLANE, _round_up(batch_tile, _SUBLANE))
    Bp = _round_up(B, batch_tile)
    grid = (Bp // batch_tile,)

    # Only the batch dim ever needs padding (feature dims stay at their true sizes).
    x = latent if Bp == B else jnp.pad(latent, ((0, Bp - B), (0, 0)))

    def const_spec(shape):
        # Grid-invariant operand: same block every step -> single buffer, fetched once.
        return pl.BlockSpec(shape, lambda i: (0, 0), pipeline_mode=pl.Buffered(1))

    out = pl.pallas_call(
        functools.partial(_mlp_kernel, cast_bf16=cast_bf16),
        out_shape=jax.ShapeDtypeStruct((Bp, A), jnp.float32),
        grid_spec=pltpu.PrefetchScalarGridSpec(
            num_scalar_prefetch=0,
            grid=grid,
            in_specs=[
                pl.BlockSpec((batch_tile, L), lambda i: (i, 0)),  # latent tile (unpadded K)
                const_spec((L, H1)),
                const_spec((1, H1)),
                const_spec((H1, H2)),
                const_spec((1, H2)),
                const_spec((H2, A)),
                const_spec((1, A)),
            ],
            out_specs=pl.BlockSpec((batch_tile, A), lambda i: (i, 0)),
        ),
        compiler_params=pltpu.CompilerParams(
            dimension_semantics=("parallel",),
        ),
    )(x, params["w1"], params["b1"], params["w2"], params["b2"],
      params["w3"], params["b3"])

    return out if Bp == B else out[:B]


def init_params(key, latent_dim, net_dims, action_dim):
    """Deterministic synthetic init (uniform +-1/sqrt(fan_in), like nn.Linear's range)."""
    dims = [latent_dim] + list(net_dims) + [action_dim]
    params = {}
    for idx in range(len(dims) - 1):
        fan_in, fan_out = dims[idx], dims[idx + 1]
        key, kw, kb = jax.random.split(key, 3)
        bound = 1.0 / jnp.sqrt(fan_in)
        params[f"w{idx + 1}"] = jax.random.uniform(
            kw, (fan_in, fan_out), jnp.float32, -bound, bound)
        params[f"b{idx + 1}"] = jax.random.uniform(
            kb, (1, fan_out), jnp.float32, -bound, bound)
    return params


def reference_forward(latent, params):
    h = jnp.maximum(latent @ params["w1"] + params["b1"], 0.0)
    h = jnp.maximum(h @ params["w2"] + params["b2"], 0.0)
    return jnp.tanh(h @ params["w3"] + params["b3"])


if __name__ == "__main__":
    # ContinuousActionNet(latent_dim=32, action_dim=8, net_dims=(64, 32))
    LATENT_DIM = 32
    NET_DIMS = (64, 32)
    ACTION_DIM = 8
    BATCH = 8

    key = jax.random.PRNGKey(0)
    key, k_x, k_x2, k_x3 = jax.random.split(key, 4)
    params = init_params(key, LATENT_DIM, NET_DIMS, ACTION_DIM)

    # Case 1: small batch (single grid step, whole batch in one tile), f32 path.
    latent = jax.random.normal(k_x, (BATCH, LATENT_DIM), jnp.float32)
    out = jax.block_until_ready(continuous_action_net(latent, params))
    ref = reference_forward(latent, params)
    assert out.shape == (BATCH, ACTION_DIM)
    assert jnp.allclose(out, ref, atol=1e-5, rtol=1e-5), "mismatch vs JAX reference (B=8)"

    # Case 2: batch not a multiple of the sublane size (exercises batch-padding path).
    latent2 = jax.random.normal(k_x2, (12, LATENT_DIM), jnp.float32)
    out2 = jax.block_until_ready(continuous_action_net(latent2, params))
    ref2 = reference_forward(latent2, params)
    assert out2.shape == (12, ACTION_DIM)
    assert jnp.allclose(out2, ref2, atol=1e-5, rtol=1e-5), "mismatch vs JAX reference (B=12)"

    # Case 3: mid-size batch -> 2 grid steps (even grid for v7x megacore), f32 path.
    latent3 = jax.random.normal(k_x3, (300, LATENT_DIM), jnp.float32)
    out3 = jax.block_until_ready(continuous_action_net(latent3, params))
    ref3 = reference_forward(latent3, params)
    assert out3.shape == (300, ACTION_DIM)
    assert jnp.allclose(out3, ref3, atol=1e-5, rtol=1e-5), "mismatch vs JAX reference (B=300)"

    # Case 4: bf16 MXU path (weights pre-cast once, off the hot path); looser tolerance
    # because bf16 operands are an expected ~1e-2 precision loss, not a bug.
    params_bf16 = prepare_params(params, use_bf16_matmul=True)
    out4 = jax.block_until_ready(continuous_action_net(latent, params_bf16))
    assert out4.shape == (BATCH, ACTION_DIM)
    assert jnp.allclose(out4, ref, atol=5e-2), "mismatch vs JAX reference (bf16 path)"

    print("KERNEL_OK")
</pallas_src>

<mosaic_0001>
module attributes {stable_mosaic.version = 11 : i64} {
  func.func @_mlp_kernel(%arg0: i32, %arg1: memref<8x32xf32, #tpu.memory_space<vmem>>, %arg2: memref<32x64xf32, #tpu.memory_space<vmem>>, %arg3: memref<1x64xf32, #tpu.memory_space<vmem>>, %arg4: memref<64x32xf32, #tpu.memory_space<vmem>>, %arg5: memref<1x32xf32, #tpu.memory_space<vmem>>, %arg6: memref<32x8xf32, #tpu.memory_space<vmem>>, %arg7: memref<1x8xf32, #tpu.memory_space<vmem>>, %arg8: memref<8x8xf32, #tpu.memory_space<vmem>>) attributes {dimension_semantics = [#tpu.dimension_semantics<parallel>], iteration_bounds = array<i64: 1>, scalar_prefetch = 0 : i64, scratch_operands = 0 : i64, tpu.core_type = #tpu.core_type<tc>, window_params = [{transform_indices = @transform_0, window_bounds = array<i64: 8, 32>}, {pipeline_mode = #tpu.pipeline_mode<synchronous>, transform_indices = @transform_1, window_bounds = array<i64: 32, 64>}, {pipeline_mode = #tpu.pipeline_mode<synchronous>, transform_indices = @transform_2, window_bounds = array<i64: 1, 64>}, {pipeline_mode = #tpu.pipeline_mode<synchronous>, transform_indices = @transform_3, window_bounds = array<i64: 64, 32>}, {pipeline_mode = #tpu.pipeline_mode<synchronous>, transform_indices = @transform_4, window_bounds = array<i64: 1, 32>}, {pipeline_mode = #tpu.pipeline_mode<synchronous>, transform_indices = @transform_5, window_bounds = array<i64: 32, 8>}, {pipeline_mode = #tpu.pipeline_mode<synchronous>, transform_indices = @transform_6, window_bounds = array<i64: 1, 8>}, {transform_indices = @transform_7, window_bounds = array<i64: 8, 8>}]} {
    %c0 = arith.constant 0 : index
    %c0_0 = arith.constant 0 : index
    %0 = vector.load %arg1[%c0, %c0_0] : memref<8x32xf32, #tpu.memory_space<vmem>>, vector<8x32xf32>
    %c0_1 = arith.constant 0 : index
    %c0_2 = arith.constant 0 : index
    %1 = vector.load %arg2[%c0_1, %c0_2] : memref<32x64xf32, #tpu.memory_space<vmem>>, vector<32x64xf32>
    %cst = arith.constant dense<0.000000e+00> : vector<8x64xf32>
    %2 = tpu.matmul %0, %1, %cst {dimension_numbers = #tpu.dot_dimension_numbers<[1], [0], [0], [1], [0, 0, 1, 1], [], []>} : vector<8x32xf32>, vector<32x64xf32>, vector<8x64xf32> -> vector<8x64xf32>
    %c0_3 = arith.constant 0 : index
    %c0_4 = arith.constant 0 : index
    %3 = vector.load %arg3[%c0_3, %c0_4] : memref<1x64xf32, #tpu.memory_space<vmem>>, vector<1x64xf32>
    %4 = vector.broadcast %3 : vector<1x64xf32> to vector<8x64xf32>
    %5 = arith.addf %2, %4 : vector<8x64xf32>
    %cst_5 = arith.constant 0.000000e+00 : f32
    %6 = vector.broadcast %cst_5 : f32 to vector<8x64xf32>
    %7 = arith.maximumf %5, %6 : vector<8x64xf32>
    %c0_6 = arith.constant 0 : index
    %c0_7 = arith.constant 0 : index
    %8 = vector.load %arg4[%c0_6, %c0_7] : memref<64x32xf32, #tpu.memory_space<vmem>>, vector<64x32xf32>
    %cst_8 = arith.constant dense<0.000000e+00> : vector<8x32xf32>
    %9 = tpu.matmul %7, %8, %cst_8 {dimension_numbers = #tpu.dot_dimension_numbers<[1], [0], [0], [1], [0, 0, 1, 1], [], []>} : vector<8x64xf32>, vector<64x32xf32>, vector<8x32xf32> -> vector<8x32xf32>
    %c0_9 = arith.constant 0 : index
    %c0_10 = arith.constant 0 : index
    %10 = vector.load %arg5[%c0_9, %c0_10] : memref<1x32xf32, #tpu.memory_space<vmem>>, vector<1x32xf32>
    %11 = vector.broadcast %10 : vector<1x32xf32> to vector<8x32xf32>
    %12 = arith.addf %9, %11 : vector<8x32xf32>
    %cst_11 = arith.constant 0.000000e+00 : f32
    %13 = vector.broadcast %cst_11 : f32 to vector<8x32xf32>
    %14 = arith.maximumf %12, %13 : vector<8x32xf32>
    %c0_12 = arith.constant 0 : index
    %c0_13 = arith.constant 0 : index
    %15 = vector.load %arg6[%c0_12, %c0_13] : memref<32x8xf32, #tpu.memory_space<vmem>>, vector<32x8xf32>
    %cst_14 = arith.constant dense<0.000000e+00> : vector<8x8xf32>
    %16 = tpu.matmul %14, %15, %cst_14 {dimension_numbers = #tpu.dot_dimension_numbers<[1], [0], [0], [1], [0, 0, 1, 1], [], []>} : vector<8x32xf32>, vector<32x8xf32>, vector<8x8xf32> -> vector<8x8xf32>
    %c0_15 = arith.constant 0 : index
    %c0_16 = arith.constant 0 : index
    %17 = vector.load %arg7[%c0_15, %c0_16] : memref<1x8xf32, #tpu.memory_space<vmem>>, vector<1x8xf32>
    %18 = vector.broadcast %17 : vector<1x8xf32> to vector<8x8xf32>
    %19 = arith.addf %16, %18 : vector<8x8xf32>
    %20 = math.tanh %19 : vector<8x8xf32>
    %c0_17 = arith.constant 0 : index
    %c0_18 = arith.constant 0 : index
    %21 = vector.load %arg8[%c0_17, %c0_18] : memref<8x8xf32, #tpu.memory_space<vmem>>, vector<8x8xf32>
    tpu.vector_store %arg8[%c0_17, %c0_18], %20 {strides = array<i32>} : memref<8x8xf32, #tpu.memory_space<vmem>>, vector<8x8xf32>,
    return
  }
  func.func @transform_0(%arg0: i32) -> (i32, i32) {
    %c0_i32 = arith.constant 0 : i32
    %c0_i32_0 = arith.constant 0 : i32
    return %arg0, %c0_i32 : i32, i32
  }
  func.func @transform_1(%arg0: i32) -> (i32, i32) {
    %c0_i32 = arith.constant 0 : i32
    %c0_i32_0 = arith.constant 0 : i32
    %c0_i32_1 = arith.constant 0 : i32
    return %c0_i32, %c0_i32_0 : i32, i32
  }
  func.func @transform_2(%arg0: i32) -> (i32, i32) {
    %c0_i32 = arith.constant 0 : i32
    %c0_i32_0 = arith.constant 0 : i32
    %c0_i32_1 = arith.constant 0 : i32
    return %c0_i32, %c0_i32_0 : i32, i32
  }
  func.func @transform_3(%arg0: i32) -> (i32, i32) {
    %c0_i32 = arith.constant 0 : i32
    %c0_i32_0 = arith.constant 0 : i32
    %c0_i32_1 = arith.constant 0 : i32
    return %c0_i32, %c0_i32_0 : i32, i32
  }
  func.func @transform_4(%arg0: i32) -> (i32, i32) {
    %c0_i32 = arith.constant 0 : i32
    %c0_i32_0 = arith.constant 0 : i32
    %c0_i32_1 = arith.constant 0 : i32
    return %c0_i32, %c0_i32_0 : i32, i32
  }
  func.func @transform_5(%arg0: i32) -> (i32, i32) {
    %c0_i32 = arith.constant 0 : i32
    %c0_i32_0 = arith.constant 0 : i32
    %c0_i32_1 = arith.constant 0 : i32
    return %c0_i32, %c0_i32_0 : i32, i32
  }
  func.func @transform_6(%arg0: i32) -> (i32, i32) {
    %c0_i32 = arith.constant 0 : i32
    %c0_i32_0 = arith.constant 0 : i32
    %c0_i32_1 = arith.constant 0 : i32
    return %c0_i32, %c0_i32_0 : i32, i32
  }
  func.func @transform_7(%arg0: i32) -> (i32, i32) {
    %c0_i32 = arith.constant 0 : i32
    %c0_i32_0 = arith.constant 0 : i32
    return %arg0, %c0_i32 : i32, i32
  }
}

</mosaic_0001>

<bundles_post_ra>
// kernel: tpu_custom_call.1
= control target key start
LH: loop header
LB: loop body
LE: loop exit
PB: predicated region body
PF: predicated region fallthrough
CT: control target
= control target key end

     0   :  { %v398_v1 = vmov 0.0   ;;  %vm399_vm0 = vmmov 0   ;;  %s509_s0 = inlined_call_operand.vmem [shape: f32[8,32], index: 0, kind: input, shape index: {}]   ;;  %s510_s1 = inlined_call_operand.vmem [shape: f32[32,64], index: 1, kind: input, shape index: {}]   ;;  %s511_s2 = inlined_call_operand.vmem [shape: f32[1,64], index: 2, kind: input, shape index: {}]   ;;  %s512_s3 = inlined_call_operand.vmem [shape: f32[64,32], index: 3, kind: input, shape index: {}]   ;;  %s513_s4 = inlined_call_operand.vmem [shape: f32[1,32], index: 4, kind: input, shape index: {}]   ;;  %s514_s5 = inlined_call_operand.vmem [shape: f32[32,8], index: 5, kind: input, shape index: {}]   ;;  %s515_s6 = inlined_call_operand.vmem [shape: f32[1,8], index: 6, kind: input, shape index: {}]   ;;  %s516_s7 = inlined_call_operand.hbm [shape: f32[8,8], index: 7, kind: output, shape index: {}]  }
   0x1   :  { %v31_v0 = vld [vmem:[%s510_s1 + $0x18] sm:$0xff]  ;;  %330 = vmatprep.subr.mxu0 %v398_v1  ;;  %v30_v2 = vld [vmem:[%s510_s1 + $0x10] sm:$0xff]  ;;  %338 = vmatprep.mubr.msk.f32.mxu0 %vm399_vm0, %v398_v1  ;;  %v29_v5 = vld [vmem:[%s510_s1 + $0x8] sm:$0xff] }
   0x2   :  { %v121_v3 = vld [vmem:[%s512_s3 + $0x38] sm:$0xff]  ;;  %331 = vmatpush3.msra.mxu0 %v31_v0  ;;  %341 = vmatprep.subr.mxu1 %v398_v1  ;;  %v120_v4 = vld [vmem:[%s512_s3 + $0x30] sm:$0xff] }
   0x3   :  { %332 = vmatprep.subr.mxu0 %v398_v1  ;;  %342 = vmatpush3.msra.mxu1 %v121_v3 }
   0x4   :  { %12 = vsyncpa [#allocation3], 0  ;;  %333 = vmatpush3.msra.mxu0 %v30_v2  ;;  %343 = vmatprep.subr.mxu1 %v398_v1  ;;  %v119_v6 = vld [vmem:[%s512_s3 + $0x28] sm:$0xff]  ;;  %v28_v7 = vld [vmem:[%s510_s1] sm:$0xff]  ;;  %vm39_vm1 = vcmask 261120   ;;  %vm129_vm2 = vcmask 523264  }
   0x5   :  { %334 = vmatprep.subr.mxu0 %v398_v1  ;;  %344 = vmatpush3.msra.mxu1 %v120_v4  ;;  %v27_v8 = vld [vmem:[%s509_s0] sm:$0xff]  ;;  %v117_v10 = vld [vmem:[%s512_s3 + $0x18] sm:$0xff]  ;;  %v116_v11 = vld [vmem:[%s512_s3 + $0x10] sm:$0xff]  ;;  %vm289_vm3 = vcmask 64512  }
   0x6   :  { %335 = vmatpush3.msra.mxu0 %v29_v5  ;;  %345 = vmatprep.subr.mxu1 %v398_v1  ;;  %v118_v9 = vld [vmem:[%s512_s3 + $0x20] sm:$0xff]  ;;  %v115_v12 = vld [vmem:[%s512_s3 + $0x8] sm:$0xff]  ;;  %v207_v14 = vld [vmem:[%s514_s5 + $0x18] sm:$0xff] }
   0x7   :  { %336 = vmatprep.subr.mxu0 %v398_v1  ;;  %346 = vmatpush3.msra.mxu1 %v119_v6  ;;  %v114_v13 = vld [vmem:[%s512_s3] sm:$0xff]  ;;  %v206_v20 = vld [vmem:[%s514_s5 + $0x10] sm:$0xff]  ;;  %v205_v21 = vld [vmem:[%s514_s5 + $0x8] sm:$0xff] }
   0x8   :  { %337 = vmatpush3.msra.mxu0 %v28_v7  ;;  %347 = vmatprep.subr.mxu1 %v398_v1  ;;  %v305_v15 = vld [vmem:[%s511_s2] ss:$0 sm:$0xff] }
   0x9   :  { %339 = vmatmul.mubr.msk.f32.vlgmr.msra.gmra.mxu0 %vm39_vm1, %v27_v8  ;;  %348 = vmatpush3.msra.mxu1 %v118_v9  ;;  %v204_v22 = vld [vmem:[%s514_s5] sm:$0xff]  ;;  %s400_s5 = smov [#allocation2]  }
   0xa   :  { %349 = vmatprep.subr.mxu1 %v398_v1  ;;  %357 = vmatprep.mubr.msk.f32.mxu1 %vm399_vm0, %v398_v1  ;;  %v307_v23 = vld [vmem:[%s513_s4] ss:$0 sm:$0xff]  ;;  %s297_s14 = sshll.u32 %s400_s5, 4  ;;  %s298_s14 = int_to_ptr.vmem [resolvable:$true] %s297_s14 }
   0xb   :  { %350 = vmatpush3.msra.mxu1 %v117_v10  ;;  %360 = vmatprep.subr.mxu0 %v398_v1  ;;  %v309_v28 = vld [vmem:[%s515_s6] ss:$0 sm:$0xff]  ;;  %s376_s4 = scalar_lea.vmem %s298_s14, 128  ;;  %p381_p1 = scmp.lt.s32.totalorder %s298_s14, %s298_s14 }
   0xc   :  { %351 = vmatprep.subr.mxu1 %v398_v1  ;;  %368 = vmatprep.mubr.msk.f32.mxu0 %vm399_vm0, %v398_v1  ;;  %p377_p0 = scmp.ne.s32.totalorder %s298_s14, %s376_s4  ;;  %p382_p2 = scmp.lt.s32.totalorder %s376_s4, %s376_s4 }
   0xd   :  { %352 = vmatpush3.msra.mxu1 %v116_v11  ;;  %361 = vmatpush3.msra.mxu0 %v207_v14 }
   0xe   :  { %353 = vmatprep.subr.mxu1 %v398_v1  ;;  %362 = vmatprep.subr.mxu0 %v398_v1  ;;  %p383_p3 = por %p382_p2, %p381_p1 }
   0xf   :  { %354 = vmatpush3.msra.mxu1 %v115_v12  ;;  %363 = vmatpush3.msra.mxu0 %v206_v20 }
  0x10   :  { %355 = vmatprep.subr.mxu1 %v398_v1  ;;  %364 = vmatprep.subr.mxu0 %v398_v1  ;;  %p384_p4 = pnand %p383_p3, %p377_p0 }
  0x11   :  { %356 = vmatpush3.msra.mxu1 %v114_v13  ;;  %365 = vmatpush3.msra.mxu0 %v205_v21 }
  0x12   :  { %366 = vmatprep.subr.mxu0 %v398_v1 }
  0x13   :  { %367 = vmatpush3.msra.mxu0 %v204_v22 }
  0xc9   :  { %v109_v16 = vpop.f32.mrf.mxu0 }
  0xca   :  { %v110_v17 = vadd.f32 %v305_v15, %v109_v16 }
  0xcb   :  { %v340_v18 = vpop.f32.mrf.mxu0 }
  0xcc   :  { %v113_v19 = vmax.f32 %v110_v17, 0.0 }
  0xce   :  { %358 = vmatmul.mubr.msk.f32.vlgmr.msra.gmra.mxu1 %vm129_vm2, %v113_v19 }
 0x18e   :  { %v199_v24 = vpop.f32.mrf.mxu1 }
 0x18f   :  { %v200_v25 = vadd.f32 %v307_v23, %v199_v24 }
 0x190   :  { %v359_v26 = vpop.f32.mrf.mxu1 }
 0x191   :  { %v203_v27 = vmax.f32 %v200_v25, 0.0 }
 0x193   :  { %369 = vmatmul.mubr.msk.f32.vlgmr.msra.gmra.mxu0 %vm39_vm1, %v203_v27 }
 0x253   :  { %v284_v29 = vpop.f32.mrf.mxu0 }
 0x254   :  { %v285_v30 = vadd.f32 %v309_v28, %v284_v29 }
 0x255   :  { %v370_v31 = vpop.f32.mrf.mxu0 }
 0x256   :  { %374 = vtanh.f32 %v285_v30 }
 0x263   :  { %v375_v32 = vpop.eup %374 }
 0x264   :  { %290 = vst.msk [vmem:[#allocation2] sm:$0xff] %vm289_vm3, %v375_v32 }
 0x265   :  { %387 = shalt.err (!%p384_p4)
}
 0x266   :  { %300 = dma.vmem_to_hbm [thread:$0]  %s298_s14, 128, %s516_s7, [#allocation3]  }
 0x267   :  { %396 = dma.done.wait [#allocation3], 128  }
 0x268   :  { %397 = vsyncadd [#allocation3], 4294967168 }
 0x269   :  { %304 = vsyncpa [#allocation3], 1 }

</bundles_post_ra>
